<compile_context>
chip_gen: v6e
topology: v6e:2x2x1
jax: 0.10.0
libtpu: 0.0.40
codegen_flags: <defaults>
</compile_context>

<pallas_src>
import functools
import math

import jax
import jax.numpy as jnp
from jax import lax
from jax.experimental import pallas as pl
from jax.experimental.pallas import tpu as pltpu


def _vmem_limit(*byte_counts):
    """Explicit scoped-VMEM budget with headroom (review: don't rely on the 32 MiB default)."""
    need = sum(byte_counts)
    return int(min(128 * 2**20, max(32 * 2**20, int(1.5 * need))))


# ----------------------------------------------------------------------------
# Kernel A: fused input projection for both directions (one MXU pass over x).
#   x_ref : (tt, B, E)   bf16     w_ref : (E, 8H) bf16     b_ref : (1, 8H) f32
#   out   : (2, tt, B, 4H) f32    [0] = forward gates, [1] = backward gates
# ----------------------------------------------------------------------------
def _proj_kernel(x_ref, w_ref, b_ref, out_ref):
    tt, B, E = x_ref.shape
    G8 = w_ref.shape[1]
    G4 = G8 // 2
    x2 = x_ref[...].reshape(tt * B, E)                       # merge leading dims (layout safe)
    xg = jnp.dot(x2, w_ref[...], preferred_element_type=jnp.float32) + b_ref[...]
    out_ref[0] = xg[:, :G4].reshape(tt, B, G4)
    out_ref[1] = xg[:, G4:].reshape(tt, B, G4)


# ----------------------------------------------------------------------------
# Kernel B: length-masked LSTM recurrence, grid=(2,) over direction.
#   len_ref: (B, 1) int32     xg_ref: (T_pad, B, 4H) f32    whh_ref: (H, 4H) bf16
#   out_ref: (T, B, H) f32    h_sc/c_sc: (B, H) f32 scratch
# ----------------------------------------------------------------------------
def _recurrence_kernel(len_ref, xg_ref, whh_ref, out_ref, h_sc, c_sc, *, T, unroll):
    _, B, G4 = xg_ref.shape
    H = G4 // 4

    lens = len_ref[...]                                      # (B, 1) int32
    whh = whh_ref[...]                                       # (H, 4H) bf16, resident across loop
    h_sc[...] = jnp.zeros_like(h_sc)
    c_sc[...] = jnp.zeros_like(c_sc)

    rev = pl.program_id(0) == 1                              # direction 1 runs time-reversed
    t0 = jnp.where(rev, T - 1, 0)
    dt = jnp.where(rev, -1, 1)

    def step(i, carry):
        t = t0 + dt * i
        gates = xg_ref[t] + jnp.dot(h_sc[...].astype(jnp.bfloat16), whh,
                                    preferred_element_type=jnp.float32)   # (B, 4H) f32
        ig = jax.nn.sigmoid(gates[:, 0:H])
        fg = jax.nn.sigmoid(gates[:, H:2 * H])
        gg = jnp.tanh(gates[:, 2 * H:3 * H])
        og = jax.nn.sigmoid(gates[:, 3 * H:4 * H])
        c_new = fg * c_sc[...] + ig * gg
        h_new = og * jnp.tanh(c_new)
        m = t < lens                                         # packed-sequence mask (B, 1)
        c_sc[...] = jnp.where(m, c_new, c_sc[...])
        h_sc[...] = jnp.where(m, h_new, h_sc[...])
        out_ref[t] = jnp.where(m, h_new, 0.0).astype(out_ref.dtype)
        return carry

    lax.fori_loop(0, T, step, 0, unroll=unroll)


def bilstm_pallas(x_bte, lengths, p):
    """Bidirectional 1-layer LSTM with length masking. (B, T, E) f32 -> (B, T, 2H) f32."""
    B, T, E = x_bte.shape
    H = p["w_hh_f"].shape[1]
    G4, G8 = 4 * H, 8 * H

    # Fused, transposed weights.  Matmul operands in bf16 (MXU-native); bias/accum stay f32.
    w_cat = jnp.concatenate([p["w_ih_f"].T, p["w_ih_b"].T], axis=1).astype(jnp.bfloat16)   # (E, 8H)
    b_cat = jnp.concatenate([p["b_ih_f"] + p["b_hh_f"],
                             p["b_ih_b"] + p["b_hh_b"]]).reshape(1, G8).astype(jnp.float32)
    whh = jnp.stack([p["w_hh_f"].T, p["w_hh_b"].T]).astype(jnp.bfloat16)                   # (2, H, 4H)
    lens2 = lengths.reshape(B, 1).astype(jnp.int32)

    # Time-major bf16 activations; pad T so the projection grid tiles evenly.
    tt = min(T, 128)
    T_pad = ((T + tt - 1) // tt) * tt
    x_tbe = jnp.transpose(x_bte, (1, 0, 2)).astype(jnp.bfloat16)
    if T_pad != T:
        x_tbe = jnp.pad(x_tbe, ((0, T_pad - T), (0, 0), (0, 0)))

    # ---- Kernel A: fused input projection, pipelined over T tiles --------------------
    vmem_a = _vmem_limit(2 * tt * B * E * 2, E * G8 * 2, G8 * 4, 2 * 2 * tt * B * G4 * 4)
    xg = pl.pallas_call(
        _proj_kernel,
        grid=(T_pad // tt,),
        in_specs=[pl.BlockSpec((tt, B, E), lambda i: (i, 0, 0)),
                  pl.BlockSpec((E, G8), lambda i: (0, 0)),
                  pl.BlockSpec((1, G8), lambda i: (0, 0))],
        out_specs=pl.BlockSpec((2, tt, B, G4), lambda i: (0, i, 0, 0)),
        out_shape=jax.ShapeDtypeStruct((2, T_pad, B, G4), jnp.float32),
        compiler_params=pltpu.CompilerParams(
            dimension_semantics=("parallel",), vmem_limit_bytes=vmem_a),
    )(x_tbe, w_cat, b_cat)

    # ---- Kernel B: per-direction masked recurrence (directions parallel across cores) -
    unroll = True if T <= 32 else next(u for u in (8, 4, 2, 1) if T % u == 0)
    vmem_b = _vmem_limit(2 * T_pad * B * G4 * 4, 2 * H * G4 * 2, 8 * 128 * 4,
                         2 * T * B * H * 4, 2 * B * H * 4)
    out2 = pl.pallas_call(
        functools.partial(_recurrence_kernel, T=T, unroll=unroll),
        grid=(2,),
        in_specs=[pl.BlockSpec((B, 1), lambda d: (0, 0)),
                  pl.BlockSpec((None, T_pad, B, G4), lambda d: (d, 0, 0, 0)),
                  pl.BlockSpec((None, H, G4), lambda d: (d, 0, 0))],
        out_specs=pl.BlockSpec((None, T, B, H), lambda d: (d, 0, 0, 0)),
        out_shape=jax.ShapeDtypeStruct((2, T, B, H), jnp.float32),
        scratch_shapes=[pltpu.VMEM((B, H), jnp.float32),       # h state
                        pltpu.VMEM((B, H), jnp.float32)],      # c state
        compiler_params=pltpu.CompilerParams(
            dimension_semantics=("parallel",), vmem_limit_bytes=vmem_b),
    )(lens2, xg, whh)

    # (2, T, B, H) -> (B, T, 2H)   (forward -> [..., :H], backward -> [..., H:])
    return jnp.transpose(out2, (2, 1, 0, 3)).reshape(B, T, 2 * H)


# ----------------------------------------------------------------------------
# Pure-JAX f32 reference (PyTorch semantics) used only for the correctness check.
# ----------------------------------------------------------------------------
def _lstm_dir_ref(x_tbe, lens2, wih_t, whh_t, b, reverse):
    T, B, _ = x_tbe.shape
    H = whh_t.shape[0]
    h = jnp.zeros((B, H), jnp.float32)
    c = jnp.zeros((B, H), jnp.float32)
    outs = [None] * T
    ts = range(T - 1, -1, -1) if reverse else range(T)
    for t in ts:
        gates = x_tbe[t] @ wih_t + h @ whh_t + b
        i = jax.nn.sigmoid(gates[:, :H]); f = jax.nn.sigmoid(gates[:, H:2 * H])
        g = jnp.tanh(gates[:, 2 * H:3 * H]); o = jax.nn.sigmoid(gates[:, 3 * H:])
        c_new = f * c + i * g
        h_new = o * jnp.tanh(c_new)
        m = t < lens2
        c = jnp.where(m, c_new, c); h = jnp.where(m, h_new, h)
        outs[t] = jnp.where(m, h_new, 0.0)
    return jnp.stack(outs, 0)


def bilstm_ref(x_bte, lengths, p):
    B, T, E = x_bte.shape
    H = p["w_hh_f"].shape[1]
    x_tbe = jnp.transpose(x_bte, (1, 0, 2)).astype(jnp.float32)
    lens2 = lengths.reshape(B, 1).astype(jnp.int32)
    f = _lstm_dir_ref(x_tbe, lens2, p["w_ih_f"].T, p["w_hh_f"].T,
                      (p["b_ih_f"] + p["b_hh_f"]).reshape(1, 4 * H), False)
    b = _lstm_dir_ref(x_tbe, lens2, p["w_ih_b"].T, p["w_hh_b"].T,
                      (p["b_ih_b"] + p["b_hh_b"]).reshape(1, 4 * H), True)
    return jnp.transpose(jnp.concatenate([f, b], -1), (1, 0, 2))


# ----------------------------------------------------------------------------
# Encoder forward (inference mode).
# ----------------------------------------------------------------------------
def encoder_forward(word_vectors, params, doc_idxs, query_idxs, doc_len, query_len,
                    bilstm_fn=bilstm_pallas):
    # Embedding lookup is a gather — kept as plain-JAX glue.
    doc_emb = jnp.take(word_vectors, doc_idxs, axis=0)       # (B, Td, 300)
    query_emb = jnp.take(word_vectors, query_idxs, axis=0)   # (B, Tq, 300)
    # F.dropout(..., training=False) is identity.
    out_doc = bilstm_fn(doc_emb, doc_len, params["bilstm1"])        # (B, Td, 2H)
    out_query = bilstm_fn(query_emb, query_len, params["bilstm2"])  # (B, Tq, 2H)
    u_doc = jnp.concatenate([out_doc, doc_emb], axis=2)             # (B, Td, 2H+300)
    u_query = jnp.concatenate([out_query, query_emb], axis=2)       # (B, Tq, 2H+300)
    # InputVariationalDropout is identity at inference.
    return u_doc, u_query


def init_lstm_params(key, input_size, hidden_size):
    k = 1.0 / math.sqrt(hidden_size)
    ks = jax.random.split(key, 8)
    u = lambda kk, shape: jax.random.uniform(kk, shape, jnp.float32, -k, k)
    G = 4 * hidden_size
    return {
        "w_ih_f": u(ks[0], (G, input_size)), "w_hh_f": u(ks[1], (G, hidden_size)),
        "b_ih_f": u(ks[2], (G,)),            "b_hh_f": u(ks[3], (G,)),
        "w_ih_b": u(ks[4], (G, input_size)), "w_hh_b": u(ks[5], (G, hidden_size)),
        "b_ih_b": u(ks[6], (G,)),            "b_hh_b": u(ks[7], (G,)),
    }


if __name__ == "__main__":
    VOCAB, EMBED, HIDDEN = 50, 300, 32
    B, T_DOC, T_QRY = 2, 10, 8

    key = jax.random.PRNGKey(0)
    k_wv, k_l1, k_l2, k_di, k_qi = jax.random.split(key, 5)

    word_vectors = jax.random.normal(k_wv, (VOCAB, EMBED), jnp.float32) * 0.1
    params = {
        "bilstm1": init_lstm_params(k_l1, EMBED, HIDDEN),
        "bilstm2": init_lstm_params(k_l2, EMBED, HIDDEN),
    }

    doc_w_idxs = jax.random.randint(k_di, (B, T_DOC), 0, VOCAB, jnp.int32)
    query_w_idxs = jax.random.randint(k_qi, (B, T_QRY), 0, VOCAB, jnp.int32)
    doc_len = jnp.array([10, 7], jnp.int32)
    query_len = jnp.array([8, 5], jnp.int32)

    u_doc, u_query = encoder_forward(word_vectors, params, doc_w_idxs, query_w_idxs,
                                     doc_len, query_len, bilstm_fn=bilstm_pallas)
    jax.block_until_ready((u_doc, u_query))

    # Shape checks
    assert u_doc.shape == (B, T_DOC, 2 * HIDDEN + EMBED)
    assert u_query.shape == (B, T_QRY, 2 * HIDDEN + EMBED)

    # Numerical check vs. pure-f32 reference (kernel uses bf16 MXU operands with f32
    # accumulation, so a loose tolerance covers the bf16 rounding drift over T steps).
    r_doc, r_query = encoder_forward(word_vectors, params, doc_w_idxs, query_w_idxs,
                                     doc_len, query_len, bilstm_fn=bilstm_ref)
    assert jnp.allclose(u_doc, r_doc, atol=3e-2, rtol=3e-2)
    assert jnp.allclose(u_query, r_query, atol=3e-2, rtol=3e-2)

    print("KERNEL_OK")
</pallas_src>

<mosaic_0001>
module attributes {stable_mosaic.version = 11 : i64} {
  func.func @_proj_kernel(%arg0: i32, %arg1: memref<10x2x300xbf16, #tpu.memory_space<vmem>>, %arg2: memref<300x256xbf16, #tpu.memory_space<vmem>>, %arg3: memref<1x256xf32, #tpu.memory_space<vmem>>, %arg4: memref<2x10x2x128xf32, #tpu.memory_space<vmem>>) attributes {dimension_semantics = [#tpu.dimension_semantics<parallel>], iteration_bounds = array<i64: 1>, scalar_prefetch = 0 : i64, scratch_operands = 0 : i64, tpu.core_type = #tpu.core_type<tc>, window_params = [{transform_indices = @transform_0, window_bounds = array<i64: 10, 2, 300>}, {pipeline_mode = #tpu.pipeline_mode<synchronous>, transform_indices = @transform_1, window_bounds = array<i64: 300, 256>}, {pipeline_mode = #tpu.pipeline_mode<synchronous>, transform_indices = @transform_2, window_bounds = array<i64: 1, 256>}, {transform_indices = @transform_3, window_bounds = array<i64: 2, 10, 2, 128>}]} {
    %c0 = arith.constant 0 : index
    %c0_0 = arith.constant 0 : index
    %c0_1 = arith.constant 0 : index
    %0 = vector.load %arg1[%c0, %c0_0, %c0_1] : memref<10x2x300xbf16, #tpu.memory_space<vmem>>, vector<10x2x300xbf16>
    %1 = vector.shape_cast %0 : vector<10x2x300xbf16> to vector<20x300xbf16>
    %c0_2 = arith.constant 0 : index
    %c0_3 = arith.constant 0 : index
    %2 = vector.load %arg2[%c0_2, %c0_3] : memref<300x256xbf16, #tpu.memory_space<vmem>>, vector<300x256xbf16>
    %cst = arith.constant dense<0.000000e+00> : vector<20x256xf32>
    %3 = tpu.matmul %1, %2, %cst {dimension_numbers = #tpu.dot_dimension_numbers<[1], [0], [0], [1], [0, 0, 1, 1], [], []>} : vector<20x300xbf16>, vector<300x256xbf16>, vector<20x256xf32> -> vector<20x256xf32>
    %c0_4 = arith.constant 0 : index
    %c0_5 = arith.constant 0 : index
    %4 = vector.load %arg3[%c0_4, %c0_5] : memref<1x256xf32, #tpu.memory_space<vmem>>, vector<1x256xf32>
    %5 = vector.broadcast %4 : vector<1x256xf32> to vector<20x256xf32>
    %6 = arith.addf %3, %5 : vector<20x256xf32>
    %7 = vector.extract_strided_slice %6 {offsets = [0, 0], sizes = [20, 128], strides = [1, 1]} : vector<20x256xf32> to vector<20x128xf32>
    %8 = vector.shape_cast %7 : vector<20x128xf32> to vector<10x2x128xf32>
    %c0_6 = arith.constant 0 : index
    %c0_7 = arith.constant 0 : index
    %c0_8 = arith.constant 0 : index
    %c0_9 = arith.constant 0 : index
    %9 = vector.load %arg4[%c0_6, %c0_7, %c0_8, %c0_9] : memref<2x10x2x128xf32, #tpu.memory_space<vmem>>, vector<1x10x2x128xf32>
    %10 = vector.shape_cast %9 : vector<1x10x2x128xf32> to vector<10x2x128xf32>
    %11 = vector.shape_cast %8 : vector<10x2x128xf32> to vector<1x10x2x128xf32>
    tpu.vector_store %arg4[%c0_6, %c0_7, %c0_8, %c0_9], %11 {strides = array<i32>} : memref<2x10x2x128xf32, #tpu.memory_space<vmem>>, vector<1x10x2x128xf32>,
    %12 = vector.extract_strided_slice %6 {offsets = [0, 128], sizes = [20, 128], strides = [1, 1]} : vector<20x256xf32> to vector<20x128xf32>
    %13 = vector.shape_cast %12 : vector<20x128xf32> to vector<10x2x128xf32>
    %c1 = arith.constant 1 : index
    %c0_10 = arith.constant 0 : index
    %c0_11 = arith.constant 0 : index
    %c0_12 = arith.constant 0 : index
    %14 = vector.load %arg4[%c1, %c0_10, %c0_11, %c0_12] : memref<2x10x2x128xf32, #tpu.memory_space<vmem>>, vector<1x10x2x128xf32>
    %15 = vector.shape_cast %14 : vector<1x10x2x128xf32> to vector<10x2x128xf32>
    %16 = vector.shape_cast %13 : vector<10x2x128xf32> to vector<1x10x2x128xf32>
    tpu.vector_store %arg4[%c1, %c0_10, %c0_11, %c0_12], %16 {strides = array<i32>} : memref<2x10x2x128xf32, #tpu.memory_space<vmem>>, vector<1x10x2x128xf32>,
    return
  }
  func.func @transform_0(%arg0: i32) -> (i32, i32, i32) {
    %c0_i32 = arith.constant 0 : i32
    %c0_i32_0 = arith.constant 0 : i32
    %c0_i32_1 = arith.constant 0 : i32
    return %arg0, %c0_i32, %c0_i32_0 : i32, i32, i32
  }
  func.func @transform_1(%arg0: i32) -> (i32, i32) {
    %c0_i32 = arith.constant 0 : i32
    %c0_i32_0 = arith.constant 0 : i32
    %c0_i32_1 = arith.constant 0 : i32
    return %c0_i32, %c0_i32_0 : i32, i32
  }
  func.func @transform_2(%arg0: i32) -> (i32, i32) {
    %c0_i32 = arith.constant 0 : i32
    %c0_i32_0 = arith.constant 0 : i32
    %c0_i32_1 = arith.constant 0 : i32
    return %c0_i32, %c0_i32_0 : i32, i32
  }
  func.func @transform_3(%arg0: i32) -> (i32, i32, i32, i32) {
    %c0_i32 = arith.constant 0 : i32
    %c0_i32_0 = arith.constant 0 : i32
    %c0_i32_1 = arith.constant 0 : i32
    %c0_i32_2 = arith.constant 0 : i32
    return %c0_i32, %arg0, %c0_i32_0, %c0_i32_1 : i32, i32, i32, i32
  }
}

</mosaic_0001>

<bundles_post_ra>
// kernel: tpu_custom_call.1
= control target key start
LH: loop header
LB: loop body
LE: loop exit
PB: predicated region body
PF: predicated region fallthrough
CT: control target
= control target key end

     0   :  { %8 = vsyncpa [#allocation3], 0  ;;  %s915_s0 = inlined_call_operand.hbm [shape: bf16[10,2,300], index: 0, kind: input, shape index: {}]   ;;  %s916_s1 = inlined_call_operand.hbm [shape: bf16[300,256], index: 1, kind: input, shape index: {}]   ;;  %s917_s2 = inlined_call_operand.vmem [shape: f32[1,256], index: 2, kind: input, shape index: {}]   ;;  %s918_s3 = inlined_call_operand.hbm [shape: f32[2,10,2,128], index: 3, kind: output, shape index: {}]  }
   0x1   :  { %9 = vsyncpa [#allocation6], 0 }
   0x2   :  { %10 = vsyncpa [#allocation4], 0  ;;  %s848_s12 = smov [#allocation2]  }
   0x3   :  { %s16_s13 = sshll.u32 %s848_s12, 4  ;;  %s17_s13 = int_to_ptr.vmem [resolvable:$true] %s16_s13 }
   0x4   :  { %s790_s14 = scalar_lea.vmem %s17_s13, 480  ;;  %p795_p1 = scmp.lt.s32.totalorder %s17_s13, %s17_s13 }
   0x5   :  { %p791_p0 = scmp.ne.s32.totalorder %s17_s13, %s790_s14  ;;  %p796_p2 = scmp.lt.s32.totalorder %s790_s14, %s790_s14 }
   0x7   :  { %p797_p3 = por %p796_p2, %p795_p1 }
   0x9   :  { %p798_p4 = pnand %p797_p3, %p791_p0 }
   0xb   :  { %801 = shalt.err (!%p798_p4)
}
   0xc   :  { %s849_s15 = smov 48   ;;  %s850_s16 = smov 3  }
   0xd   :  { %22 = dma.hbm_to_vmem [thread:$0]  %s915_s0, 480, %s17_s13, [#allocation3], %s849_s15, %s849_s15, %s850_s16  }
   0xe   :  { %s851_s19 = smov [#allocation5]  }
   0xf   :  { %s28_s20 = sshll.u32 %s851_s19, 4  ;;  %s29_s20 = int_to_ptr.vmem [resolvable:$true] %s28_s20 }
  0x10   :  { %s810_s21 = scalar_lea.vmem %s29_s20, 4864  ;;  %p815_p6 = scmp.lt.s32.totalorder %s29_s20, %s29_s20 }
  0x11   :  { %p811_p5 = scmp.ne.s32.totalorder %s29_s20, %s810_s21  ;;  %p816_p7 = scmp.lt.s32.totalorder %s810_s21, %s810_s21 }
  0x13   :  { %p817_p8 = por %p816_p7, %p815_p6 }
  0x15   :  { %p818_p9 = pnand %p817_p8, %p811_p5 }
  0x17   :  { %821 = shalt.err (!%p818_p9)
}
  0x18   :  { %s852_s22 = smov 128   ;;  %s853_s23 = smov 8  }
  0x19   :  { %34 = dma.hbm_to_vmem [thread:$0]  %s916_s1, 4864, %s29_s20, [#allocation6], %s852_s22, %s852_s22, %s853_s23  }
  0x1a   :  { %842 = dma.done.wait [#allocation3], 480  }
  0x1b   :  { %843 = vsyncadd [#allocation3], 4294966816 }
  0x1c   :  { %844 = dma.done.wait [#allocation6], 4864  }
  0x1d   :  { %845 = vsyncadd [#allocation6], 4294962432  ;;  %v854_v0 = vmov 0   ;;  %v725_v1 = vld [vmem:[#allocation5 + $0x74] ss:$8 sps:$4 sm:$0xff]   ;;  %v94_v11 = vlaneseq  ;;  %vm404_vm0 = vcmask 1045504  }
  0x1e   :  { %494 = vmatprep.mubr.bf16.mxu1 %v854_v0  ;;  %v727_v2 = vld [vmem:[#allocation5 + $0x70] ss:$8 sps:$4 sm:$0xff]   ;;  %411 = vmatprep.subr.bf16.mxu0 %v725_v1  ;;  %v728_v3 = vld [vmem:[#allocation5 + $0x64] ss:$8 sps:$4 sm:$0xff]   ;;  %v730_v4 = vld [vmem:[#allocation5 + $0x60] ss:$8 sps:$4 sm:$0xff]  }
  0x1f   :  { %412 = vmatpush1.bf16.msra.mxu0 %v727_v2  ;;  %v731_v5 = vld [vmem:[#allocation5 + $0x54] ss:$8 sps:$4 sm:$0xff]   ;;  %v733_v6 = vld [vmem:[#allocation5 + $0x50] ss:$8 sps:$4 sm:$0xff]   ;;  %v734_v7 = vld [vmem:[#allocation5 + $0x44] ss:$8 sps:$4 sm:$0xff]  }
  0x20   :  { %413 = vmatprep.subr.bf16.mxu0 %v728_v3  ;;  %v736_v8 = vld [vmem:[#allocation5 + $0x40] ss:$8 sps:$4 sm:$0xff]   ;;  %v737_v9 = vld [vmem:[#allocation5 + $0x34] ss:$8 sps:$4 sm:$0xff]   ;;  %v739_v10 = vld [vmem:[#allocation5 + $0x30] ss:$8 sps:$4 sm:$0xff]  }
  0x21   :  { %v740_v12 = vld [vmem:[#allocation5 + $0x24] ss:$8 sps:$4 sm:$0xff]   ;;  %v855_v13 = vmov 1966171168   ;;  %v742_v17 = vld [vmem:[#allocation5 + $0x20] ss:$8 sps:$4 sm:$0xff]  }
  0x22   :  { %v119_v14 = vunpack.c.l.s4 %v855_v13  ;;  %v763_v15 = vld [vmem:[#allocation5 + $0x124] ss:$8 sps:$4 sm:$0x3f]   ;;  %v766_v16 = vld [vmem:[#allocation5 + $0x120] ss:$8 sps:$4 sm:$0x3f]  }
  0x23   :  { %414 = vmatpush1.bf16.msra.mxu0 %v730_v4  ;;  %700 = vmatprep.subr.msk.bf16.mxu1 %vm404_vm0, %v763_v15  ;;  %v887_v18 = vshrl.u32 %v94_v11, 7  ;;  %v743_v19 = vld [vmem:[#allocation5 + $0x14] ss:$8 sps:$4 sm:$0xff]   ;;  %v406_v20 = vsel %vm404_vm0, %v766_v16, 0  ;;  %v772_v23 = vld [vmem:[#allocation5 + $0x110] ss:$8 sps:$4 sm:$0xff]  }
  0x24   :  { %415 = vmatprep.subr.bf16.mxu0 %v731_v5  ;;  %v769_v21 = vld [vmem:[#allocation5 + $0x114] ss:$8 sps:$4 sm:$0xff]   ;;  %v120_v22 = vunpack.c.0.s8 %v119_v14  ;;  %473 = vmatpush1.bf16.msra.mxu1 %v406_v20  ;;  %v745_v24 = vld [vmem:[#allocation5 + $0x10] ss:$8 sps:$4 sm:$0xff]   ;;  %v746_v25 = vld [vmem:[#allocation5 + $0x4] ss:$8 sps:$4 sm:$0xff]  }
  0x25   :  { %474 = vmatprep.subr.bf16.mxu1 %v769_v21  ;;  %v775_v26 = vld [vmem:[#allocation5 + $0x104] ss:$8 sps:$4 sm:$0xff]   ;;  %v778_v27 = vld [vmem:[#allocation5 + $0x100] ss:$8 sps:$4 sm:$0xff]   ;;  %v49_v34 = vld [vmem:[#allocation2 + $0xf] sm:$0x7] }
  0x26   :  { %v890_v28 = vsub.s32 %v120_v22, %v887_v18  ;;  %v44_v29 = vld [vmem:[#allocation2] sm:$0x7]  ;;  %v45_v30 = vld [vmem:[#allocation2 + $0x3] sm:$0x7]  ;;  %v46_v31 = vld [vmem:[#allocation2 + $0x6] sm:$0x7] }
  0x27   :  { %416 = vmatpush1.bf16.msra.mxu0 %v733_v6  ;;  %v47_v32 = vld [vmem:[#allocation2 + $0x9] sm:$0x7]  ;;  %v48_v33 = vld [vmem:[#allocation2 + $0xc] sm:$0x7]  ;;  %v114_v35 = vcombine.low %v44_v29, %v45_v30  ;;  %v50_v37 = vld [vmem:[#allocation2 + $0x12] sm:$0x7] }
  0x28   :  { %417 = vmatprep.subr.bf16.mxu0 %v734_v7  ;;  %475 = vmatpush1.bf16.msra.mxu1 %v772_v23  ;;  %v748_v36 = vld [vmem:[#allocation5] ss:$8 sps:$4 sm:$0xff]   ;;  %v51_v38 = vld [vmem:[#allocation2 + $0x15] sm:$0x7]  ;;  %v115_v39 = vcombine.low %v46_v31, %v47_v32  ;;  %v116_v40 = vcombine.low %v48_v33, %v49_v34  ;;  %v52_v44 = vld [vmem:[#allocation2 + $0x18] sm:$0x7] }
  0x29   :  { %476 = vmatprep.subr.bf16.mxu1 %v775_v26  ;;  %v749_v41 = vld [vmem:[#allocation5 + $0xf4] ss:$8 sps:$4 sm:$0xff]   ;;  %v117_v42 = vcombine.low %v50_v37, %v51_v38  ;;  %v124_v43 = vrot.slane %v114_v35, %v890_v28  ;;  %v751_v50 = vld [vmem:[#allocation5 + $0xf0] ss:$8 sps:$4 sm:$0xff]   ;;  %v752_v53 = vld [vmem:[#allocation5 + $0xe4] ss:$8 sps:$4 sm:$0xff]  }
  0x2a   :  { %v53_v45 = vld [vmem:[#allocation2 + $0x1b] sm:$0x7]  ;;  %v131_v46 = vrot.slane %v115_v39, %v890_v28  ;;  %v138_v47 = vrot.slane %v116_v40, %v890_v28  ;;  %v754_v61 = vld [vmem:[#allocation5 + $0xe0] ss:$8 sps:$4 sm:$0xff]   ;;  %vm397_vm1 = vcmask 359424   ;;  %v96_v26 = vsub.s32 0, %v887_v18 }
  0x2b   :  { %418 = vmatpush1.bf16.msra.mxu0 %v736_v8  ;;  %v145_v48 = vrot.slane %v117_v42, %v890_v28  ;;  %v181_v49 = vcombine.low %v52_v44, %v53_v45  ;;  %v755_v62 = vld [vmem:[#allocation5 + $0xd4] ss:$8 sps:$4 sm:$0xff]   ;;  %v757_v3 = vld [vmem:[#allocation5 + $0xd0] ss:$8 sps:$4 sm:$0xff]   ;;  %v758_v4 = vld [vmem:[#allocation5 + $0xc4] ss:$8 sps:$4 sm:$0xff]  }
  0x2c   :  { %419 = vmatprep.subr.bf16.mxu0 %v737_v9  ;;  %477 = vmatpush1.bf16.msra.mxu1 %v778_v27  ;;  %v146_v51 = vcombine.low %v124_v43, %v131_v46  ;;  %v147_v52 = vcombine.high %v124_v43, %v131_v46  ;;  %v760_v6 = vld [vmem:[#allocation5 + $0xc0] ss:$8 sps:$4 sm:$0xff]   ;;  %v761_v7 = vld [vmem:[#allocation5 + $0xb4] ss:$8 sps:$4 sm:$0xff]   ;;  %v765_v8 = vld [vmem:[#allocation5 + $0xb0] ss:$8 sps:$4 sm:$0xff]  }
  0x2d   :  { %v148_v54 = vcombine.low %v138_v47, %v145_v48  ;;  %v149_v55 = vcombine.high %v138_v47, %v145_v48  ;;  %v188_v60 = vrot.slane %v181_v49, %v890_v28  ;;  %v767_v9 = vld [vmem:[#allocation5 + $0xa4] ss:$8 sps:$4 sm:$0xff]   ;;  %v773_v11 = vld [vmem:[#allocation5 + $0x94] ss:$8 sps:$4 sm:$0xff]   ;;  %v781_v13 = vld [vmem:[#allocation5 + $0x80] ss:$8 sps:$4 sm:$0xff]  }
  0x2e   :  { %v156_v56 = vrot.slane %v146_v51, %v890_v28  ;;  %v163_v57 = vrot.slane %v147_v52, %v890_v28  ;;  %v856_v27 = vmov 1983009808   ;;  %v92_v30 = vld [vmem:[%s917_s2] sm:$0x3]  ;;  %s857_s2 = smov [#allocation7]  }
  0x2f   :  { %420 = vmatpush1.bf16.msra.mxu0 %v739_v10  ;;  %v170_v58 = vrot.slane %v148_v54, %v890_v28  ;;  %v177_v59 = vrot.slane %v149_v55, %v890_v28  ;;  %v196_v2 = vrot.slane %v188_v60, %v890_v28  ;;  %v771_v10 = vld [vmem:[#allocation5 + $0xa0] ss:$8 sps:$4 sm:$0xff]   ;;  %v189_v14 = vcombine.high %v188_v60, %v188_v60  ;;  %s649_s26 = sshll.u32 %s857_s2, 4  ;;  %s650_s26 = int_to_ptr.vmem [resolvable:$true] %s649_s26 }
  0x30   :  { %421 = vmatprep.subr.bf16.mxu0 %v740_v12  ;;  %v777_v12 = vld [vmem:[#allocation5 + $0x90] ss:$8 sps:$4 sm:$0xff]   ;;  %v518_v29 = vunpack.c.l.s4 %v856_v27  ;;  %v97_v31 = vrot.slane %v92_v30, %v96_v26  ;;  %s822_s27 = scalar_lea.vmem %s650_s26, 640  ;;  %p827_p11 = scmp.lt.s32.totalorder %s650_s26, %s650_s26 }
  0x31   :  { %v179_v63 = vcombine.high %v156_v56, %v170_v58  ;;  %v180_v1 = vcombine.low %v163_v57, %v177_v59  ;;  %v204_v5 = vcombine.high %v196_v2, %v196_v2  ;;  %v178_v15 = vcombine.low %v156_v56, %v170_v58  ;;  %p823_p10 = scmp.ne.s32.totalorder %s650_s26, %s822_s27  ;;  %p828_p12 = scmp.lt.s32.totalorder %s822_s27, %s822_s27 }
  0x32   :  { %v203_v16 = vrot.slane %v189_v14, %v890_v28  ;;  %v100_v28 = vsub.s32 1, %v887_v18  ;;  %v519_v32 = vunpack.c.0.s8 %v518_v29 }
  0x33   :  { %422 = vmatpush1.bf16.msra.mxu0 %v742_v17  ;;  %701 = vmatmul.mubr.msk.bf16.vlgmr.msra.gmra.mxu1 %vm397_vm1, %v179_v63  ;;  %p829_p13 = por %p828_p12, %p827_p11 }
  0x34   :  { %423 = vmatprep.subr.bf16.mxu0 %v743_v19  ;;  %443 = vmatprep.mubr.bf16.mxu0 %v180_v1  ;;  %v101_v33 = vrot.slane %v92_v30, %v100_v28 }
  0x35   :  { %504 = vmatprep.mubr.bf16.mxu1 %v854_v0  ;;  %v779_v0 = vld [vmem:[#allocation5 + $0x84] ss:$8 sps:$4 sm:$0xff]   ;;  %p830_p0 = pnand %p829_p13, %p823_p10 }
  0x37   :  { %424 = vmatpush1.bf16.msra.mxu0 %v745_v24 }
  0x38   :  { %425 = vmatprep.subr.bf16.mxu0 %v746_v25 }
  0x3b   :  { %426 = vmatpush1.bf16.msra.mxu0 %v748_v36  ;;  %702 = vmatmul.mubr.msk.bf16.gmra.mxu1 %vm397_vm1, %v204_v5  ;;  %v522_v36 = vsub.s32 %v519_v32, %v887_v18 }
  0x3c   :  { %427 = vmatprep.subr.bf16.mxu0 %v749_v41 }
  0x3f   :  { %428 = vmatpush2.bf16.msra.mxu0 %v751_v50 }
  0x40   :  { %429 = vmatprep.subr.bf16.mxu0 %v752_v53 }
  0x43   :  { %430 = vmatpush2.bf16.msra.mxu0 %v754_v61 }
  0x44   :  { %431 = vmatprep.subr.bf16.mxu0 %v755_v62 }
  0x47   :  { %432 = vmatpush2.bf16.msra.mxu0 %v757_v3 }
  0x48   :  { %433 = vmatprep.subr.bf16.mxu0 %v758_v4 }
  0x4b   :  { %434 = vmatpush2.bf16.msra.mxu0 %v760_v6 }
  0x4c   :  { %435 = vmatprep.subr.bf16.mxu0 %v761_v7 }
  0x4f   :  { %436 = vmatpush2.bf16.msra.mxu0 %v765_v8 }
  0x50   :  { %437 = vmatprep.subr.bf16.mxu0 %v767_v9 }
  0x53   :  { %438 = vmatpush2.bf16.msra.mxu0 %v771_v10 }
  0x54   :  { %439 = vmatprep.subr.bf16.mxu0 %v773_v11 }
  0x57   :  { %440 = vmatpush2.bf16.msra.mxu0 %v777_v12 }
  0x58   :  { %441 = vmatprep.subr.bf16.mxu0 %v779_v0 }
  0x5b   :  { %442 = vmatpush2.bf16.msra.mxu0 %v781_v13 }
  0x5e   :  { %444 = vmatmul.mubr.bf16.vlgmr.msra.gmra.mxu0 %v178_v15 }
  0x5f   :  { %453 = vmatprep.mubr.bf16.mxu0 %v203_v16 }
  0x66   :  { %454 = vmatmul.mubr.bf16.gmra.mxu0 %v196_v2 }
  0xf3   :  { %v496_v17 = vpop.f32.mrf.mxu1 }
  0xf5   :  { %v498_v19 = vpop.f32.mrf.mxu1 }
  0xf7   :  { %v500_v20 = vpop.f32.mrf.mxu1 }
  0xf9   :  { %v502_v21 = vpop.f32.mrf.mxu1 }
  0xfb   :  { %v506_v22 = vpop.f32.mrf.mxu1 }
  0xfd   :  { %v508_v23 = vpop.f32.mrf.mxu1 }
  0xff   :  { %v510_v24 = vpop.f32.mrf.mxu1 }
 0x101   :  { %v511_v25 = vpop.f32.mrf.mxu1 }
 0x11e   :  { %v445_v34 = vpop.f32.mrf.mxu0 }
 0x11f   :  { %v446_v35 = vadd.f32 %v445_v34, %v97_v31 }
 0x120   :  { %v447_v37 = vpop.f32.mrf.mxu0 }
 0x121   :  { %v497_v38 = vadd.f32 %v496_v17, %v446_v35  ;;  %v448_v39 = vadd.f32 %v447_v37, %v101_v33 }
 0x122   :  { %v449_v40 = vpop.f32.mrf.mxu0 }
 0x123   :  { %v516_v41 = vcombine.high %v497_v38, %v497_v38  ;;  %v523_v42 = vrot.slane %v497_v38, %v522_v36  ;;  %703 = vst.sshfl [vmem:[#allocation7] sm:$0x3 pattern:$0x76325410] %v497_v38  ;;  %v499_v43 = vadd.f32 %v498_v19, %v448_v39  ;;  %v450_v44 = vadd.f32 %v449_v40, %v97_v31 }
 0x124   :  { %v451_v45 = vpop.f32.mrf.mxu0 }
 0x125   :  { %v530_v46 = vrot.slane %v516_v41, %v522_v36  ;;  %v531_v47 = vcombine.high %v523_v42, %v523_v42  ;;  %704 = vst.sshfl [vmem:[#allocation7 + $0x4] sm:$0x3 pattern:$0x76325410] %v516_v41  ;;  %v581_v48 = vcombine.high %v499_v43, %v499_v43  ;;  %v588_v49 = vrot.slane %v499_v43, %v522_v36 }
 0x126   :  { %708 = vst.sshfl [vmem:[#allocation7 + $0x14] sm:$0x3 pattern:$0x76325410] %v499_v43  ;;  %v501_v50 = vadd.f32 %v500_v20, %v450_v44  ;;  %v452_v51 = vadd.f32 %v451_v45, %v101_v33  ;;  %v455_v52 = vpop.f32.mrf.mxu0 }
 0x127   :  { %v532_v18 = vcombine.high %v530_v46, %v530_v46  ;;  %569 = vst [vmem:[#allocation7 + $0x2] sm:$0x3] %v531_v47  ;;  %v595_v53 = vrot.slane %v581_v48, %v522_v36  ;;  %v596_v54 = vcombine.high %v588_v49, %v588_v49  ;;  %709 = vst.sshfl [vmem:[#allocation7 + $0x18] sm:$0x3 pattern:$0x76325410] %v581_v48 }
 0x128   :  { %v456_v55 = vadd.f32 %v455_v52, %v97_v31  ;;  %v533_v56 = vcombine.high %v501_v50, %v501_v50  ;;  %v540_v57 = vrot.slane %v501_v50, %v522_v36  ;;  %705 = vst.sshfl [vmem:[#allocation7 + $0x8] sm:$0x3 pattern:$0x76325410] %v501_v50  ;;  %v503_v58 = vadd.f32 %v502_v21, %v452_v51  ;;  %v457_v59 = vpop.f32.mrf.mxu0 }
 0x129   :  { %571 = vst [vmem:[#allocation7 + $0x6] sm:$0x3] %v532_v18  ;;  %v597_v60 = vcombine.high %v595_v53, %v595_v53  ;;  %635 = vst [vmem:[#allocation7 + $0x16] sm:$0x3] %v596_v54  ;;  %v458_v62 = vadd.f32 %v457_v59, %v101_v33 }
 0x12a   :  { %v507_v61 = vadd.f32 %v506_v22, %v456_v55  ;;  %v547_v63 = vrot.slane %v533_v56, %v522_v36  ;;  %v548_v1 = vcombine.high %v540_v57, %v540_v57  ;;  %706 = vst.sshfl [vmem:[#allocation7 + $0xc] sm:$0x3 pattern:$0x76325410] %v533_v56  ;;  %v598_v2 = vcombine.high %v503_v58, %v503_v58  ;;  %v459_v4 = vpop.f32.mrf.mxu0 }
 0x12b   :  { %v605_v3 = vrot.slane %v503_v58, %v522_v36  ;;  %710 = vst.sshfl [vmem:[#allocation7 + $0x1c] sm:$0x3 pattern:$0x76325410] %v503_v58  ;;  %637 = vst [vmem:[#allocation7 + $0x1a] sm:$0x3] %v597_v60  ;;  %v509_v6 = vadd.f32 %v508_v23, %v458_v62 }
 0x12c   :  { %v556_v5 = vrot.slane %v507_v61, %v522_v36  ;;  %707 = vst.sshfl [vmem:[#allocation7 + $0x10] sm:$0x3 pattern:$0x76325410] %v507_v61  ;;  %v549_v7 = vcombine.high %v547_v63, %v547_v63  ;;  %573 = vst [vmem:[#allocation7 + $0xa] sm:$0x3] %v548_v1  ;;  %v612_v8 = vrot.slane %v598_v2, %v522_v36  ;;  %v460_v10 = vpop.f32.mrf.mxu0 }
 0x12d   :  { %v613_v9 = vcombine.high %v605_v3, %v605_v3  ;;  %711 = vst.sshfl [vmem:[#allocation7 + $0x20] sm:$0x3 pattern:$0x76325410] %v598_v2  ;;  %v621_v12 = vrot.slane %v509_v6, %v522_v36 }
 0x12e   :  { %v557_v11 = vcombine.high %v556_v5, %v556_v5  ;;  %712 = vst.sshfl [vmem:[#allocation7 + $0x24] sm:$0x3 pattern:$0x76325410] %v509_v6  ;;  %575 = vst [vmem:[#allocation7 + $0xe] sm:$0x3] %v549_v7  ;;  %v614_v0 = vcombine.high %v612_v8, %v612_v8 }
 0x12f   :  { %639 = vst [vmem:[#allocation7 + $0x1e] sm:$0x3] %v613_v9  ;;  %v622_v13 = vcombine.high %v621_v12, %v621_v12 }
 0x130   :  { %577 = vst [vmem:[#allocation7 + $0x12] sm:$0x3] %v557_v11  ;;  %641 = vst [vmem:[#allocation7 + $0x22] sm:$0x3] %v614_v0 }
 0x131   :  { %643 = vst [vmem:[#allocation7 + $0x26] sm:$0x3] %v622_v13 }
 0x132   :  { %833 = shalt.err (!%p830_p0)
}
 0x133   :  { %s858_s28 = smov 32   ;;  %s859_s29 = smov 2  }
 0x134   :  { %655 = dma.vmem_to_hbm [thread:$0]  %s650_s26, 640, %s918_s3, [#allocation4], %s858_s28, %s858_s28, %s859_s29  }
 0x135   :  { %846 = dma.done.wait [#allocation4], 640  }
 0x136   :  { %847 = vsyncadd [#allocation4], 4294966656 }
 0x137   :  { %659 = vsyncpa [#allocation3], 1 }
 0x138   :  { %660 = vsyncpa [#allocation6], 1 }
 0x139   :  { %661 = vsyncpa [#allocation4], 1 }

</bundles_post_ra>
